<compile_context>
chip_gen: v5e
topology: v5e:2x2
jax: 0.10.0
libtpu: 0.0.40
codegen_flags: <defaults>
</compile_context>

<pallas_src>
import functools

import jax
import jax.numpy as jnp
from jax.experimental import pallas as pl
from jax.experimental.pallas import tpu as pltpu

LN_EPS = 1e-5
_LANE = 128


def _gcn_kernel(adj_ref, x_ref, wt_ref, gamma_ref, beta_ref, o_ref, *, d_out):
    # adj_ref: (TM, N), x_ref: (N, Din), wt_ref: (Din, DPAD)
    # gamma_ref/beta_ref: (1, DPAD), o_ref: (TM, DPAD)

    # Graph aggregation on the MXU (f32 accumulation).
    h = jnp.dot(adj_ref[...], x_ref[...], preferred_element_type=jnp.float32)

    # Pointwise (1x1 conv) projection; weight is pre-transposed and
    # lane-padded in the wrapper, so the RHS is already lane-contiguous.
    z = jnp.dot(h.astype(wt_ref.dtype), wt_ref[...],
                preferred_element_type=jnp.float32)

    # ReLU (dropout is identity at inference).  All epilogue math stays f32
    # (VPU/EUP bf16 is absent on v5e, and LN stats need f32 anyway).
    z = jnp.maximum(z, 0.0)

    d_pad = z.shape[-1]
    if d_pad == d_out:
        mean = jnp.mean(z, axis=-1, keepdims=True)
        zc = z - mean
        var = jnp.mean(zc * zc, axis=-1, keepdims=True)
    else:
        # Padded feature columns are exactly zero (zero weight columns + ReLU)
        # so they vanish from the sums; mask them out of the centered second
        # moment so the statistics cover only the real d_out features.
        col = jax.lax.broadcasted_iota(jnp.int32, z.shape, 1)
        mean = jnp.sum(z, axis=-1, keepdims=True) * (1.0 / d_out)
        zc = z - mean
        diff = jnp.where(col < d_out, zc, 0.0)
        var = jnp.sum(diff * diff, axis=-1, keepdims=True) * (1.0 / d_out)

    zn = zc * jax.lax.rsqrt(var + LN_EPS)
    # Padded columns get gamma=0 / beta=0 -> written as zeros (sliced off later).
    o_ref[...] = (zn * gamma_ref[...] + beta_ref[...]).astype(o_ref.dtype)


def gcn_forward(x, adj, w, gamma, beta, *, use_bf16_matmul=False, row_tile=None):
    """x: (B, N, Din), adj: (B, N, N), w: (Dout, Din), gamma/beta: (Dout,)."""
    B, N, Din = x.shape
    Dout = w.shape[0]
    out_dtype = x.dtype

    # ---- one-time layout plumbing (outside the kernel) ---------------------
    # Pre-transpose W and pad the output feature axis up to a lane multiple.
    d_pad = max(_LANE, ((Dout + _LANE - 1) // _LANE) * _LANE)
    pad = d_pad - Dout
    wt = jnp.swapaxes(w, 0, 1)                                   # (Din, Dout)
    if pad:
        wt = jnp.pad(wt, ((0, 0), (0, pad)))
        gamma = jnp.pad(gamma, (0, pad))
        beta = jnp.pad(beta, (0, pad))
    gamma2 = gamma.reshape(1, d_pad).astype(jnp.float32)
    beta2 = beta.reshape(1, d_pad).astype(jnp.float32)

    # Optional bf16 matmul inputs (f32 accumulate + f32 LayerNorm preserved).
    mm_dtype = jnp.bfloat16 if use_bf16_matmul else x.dtype
    adj_in = adj.astype(mm_dtype)
    x_in = x.astype(mm_dtype)
    wt_in = wt.astype(mm_dtype)

    # Row tile over N: bounds VMEM to ~2 * TM * N * bytes for the streamed
    # adjacency (safe under v7x's 64 MiB), and gives the projection matmul an
    # M of TM instead of a single tiny per-batch call.
    if row_tile is None:
        row_tile = next((t for t in (256, 128, 64, 32, 16, 8) if N % t == 0), N)
    tm = min(row_tile, N)
    assert N % tm == 0, (N, tm)

    kernel = functools.partial(_gcn_kernel, d_out=Dout)

    out = pl.pallas_call(
        kernel,
        out_shape=jax.ShapeDtypeStruct((B, N, d_pad), out_dtype),
        grid_spec=pltpu.PrefetchScalarGridSpec(
            num_scalar_prefetch=0,
            grid=(B, N // tm),
            in_specs=[
                # adj row tile, leading batch dim squeezed -> kernel sees 2-D.
                pl.BlockSpec((None, tm, N), lambda b, i: (b, i, 0)),
                # full x for this batch (re-used across row tiles).
                pl.BlockSpec((None, N, Din), lambda b, i: (b, 0, 0)),
                # pre-transposed, lane-padded weight (grid-invariant).
                pl.BlockSpec((Din, d_pad), lambda b, i: (0, 0)),
                pl.BlockSpec((1, d_pad), lambda b, i: (0, 0)),
                pl.BlockSpec((1, d_pad), lambda b, i: (0, 0)),
            ],
            out_specs=pl.BlockSpec((None, tm, d_pad), lambda b, i: (b, i, 0)),
        ),
        compiler_params=pltpu.CompilerParams(
            dimension_semantics=("parallel", "parallel")),
    )(adj_in, x_in, wt_in, gamma2, beta2)

    if pad:
        out = out[..., :Dout]
    return out


def reference_forward(x, adj, w, gamma, beta):
    """Pure-JAX reference with identical semantics (f32)."""
    h = jnp.einsum("bij,bjd->bid", adj, x)
    z = jnp.einsum("bnd,od->bno", h, w)
    z = jnp.maximum(z, 0.0)
    mean = jnp.mean(z, axis=-1, keepdims=True)
    var = jnp.mean(jnp.square(z - mean), axis=-1, keepdims=True)
    return (z - mean) * jax.lax.rsqrt(var + LN_EPS) * gamma + beta


if __name__ == "__main__":
    key = jax.random.PRNGKey(0)
    B, N, Din, Dout = 2, 16, 32, 32

    kx, kadj, kw = jax.random.split(key, 3)
    x = jax.random.normal(kx, (B, N, Din), dtype=jnp.float32)

    # Row-normalized random adjacency (typical GCN-style propagation matrix).
    adj_raw = jax.random.uniform(kadj, (B, N, N), dtype=jnp.float32)
    adj = adj_raw / jnp.sum(adj_raw, axis=-1, keepdims=True)

    # Deterministic parameter init (kaiming-ish for the 1x1 conv; LayerNorm
    # gamma=1 / beta=0 as in nn.LayerNorm).
    w = jax.random.normal(kw, (Dout, Din), dtype=jnp.float32) * (2.0 / Din) ** 0.5
    gamma = jnp.ones((Dout,), dtype=jnp.float32)
    beta = jnp.zeros((Dout,), dtype=jnp.float32)

    ref = reference_forward(x, adj, w, gamma, beta)

    # f32 path: bit-faithful to the PyTorch layer (tight tolerance).
    out = jax.block_until_ready(gcn_forward(x, adj, w, gamma, beta))
    assert out.shape == (B, N, Dout), out.shape
    assert jnp.allclose(out, ref, atol=1e-5, rtol=1e-5), float(
        jnp.max(jnp.abs(out - ref)))

    # bf16-matmul / f32-accumulate fast path (v6e/v7x MXU peak, half the
    # adjacency HBM traffic) — looser tolerance vs. the f32 reference.
    out_bf16 = jax.block_until_ready(
        gcn_forward(x, adj, w, gamma, beta, use_bf16_matmul=True))
    assert out_bf16.shape == (B, N, Dout), out_bf16.shape
    assert jnp.allclose(out_bf16, ref, atol=1e-1, rtol=1e-1), float(
        jnp.max(jnp.abs(out_bf16 - ref)))

    print("KERNEL_OK")
</pallas_src>

<mosaic_0001>
module attributes {stable_mosaic.version = 11 : i64} {
  func.func @_gcn_kernel(%arg0: i32, %arg1: i32, %arg2: memref<1x16x16xf32, #tpu.memory_space<vmem>>, %arg3: memref<1x16x32xf32, #tpu.memory_space<vmem>>, %arg4: memref<32x128xf32, #tpu.memory_space<vmem>>, %arg5: memref<1x128xf32, #tpu.memory_space<vmem>>, %arg6: memref<1x128xf32, #tpu.memory_space<vmem>>, %arg7: memref<1x16x128xf32, #tpu.memory_space<vmem>>) attributes {dimension_semantics = [#tpu.dimension_semantics<parallel>, #tpu.dimension_semantics<parallel>], iteration_bounds = array<i64: 2, 1>, scalar_prefetch = 0 : i64, scratch_operands = 0 : i64, tpu.core_type = #tpu.core_type<tc>, window_params = [{transform_indices = @transform_0, window_bounds = array<i64: 1, 16, 16>}, {transform_indices = @transform_1, window_bounds = array<i64: 1, 16, 32>}, {pipeline_mode = #tpu.pipeline_mode<synchronous>, transform_indices = @transform_2, window_bounds = array<i64: 32, 128>}, {pipeline_mode = #tpu.pipeline_mode<synchronous>, transform_indices = @transform_3, window_bounds = array<i64: 1, 128>}, {pipeline_mode = #tpu.pipeline_mode<synchronous>, transform_indices = @transform_4, window_bounds = array<i64: 1, 128>}, {transform_indices = @transform_5, window_bounds = array<i64: 1, 16, 128>}]} {
    %c0 = arith.constant 0 : index
    %c0_0 = arith.constant 0 : index
    %c0_1 = arith.constant 0 : index
    %0 = vector.load %arg2[%c0, %c0_0, %c0_1] : memref<1x16x16xf32, #tpu.memory_space<vmem>>, vector<1x16x16xf32>
    %1 = vector.shape_cast %0 : vector<1x16x16xf32> to vector<16x16xf32>
    %c0_2 = arith.constant 0 : index
    %c0_3 = arith.constant 0 : index
    %c0_4 = arith.constant 0 : index
    %2 = vector.load %arg3[%c0_2, %c0_3, %c0_4] : memref<1x16x32xf32, #tpu.memory_space<vmem>>, vector<1x16x32xf32>
    %3 = vector.shape_cast %2 : vector<1x16x32xf32> to vector<16x32xf32>
    %cst = arith.constant dense<0.000000e+00> : vector<16x32xf32>
    %4 = tpu.matmul %1, %3, %cst {dimension_numbers = #tpu.dot_dimension_numbers<[1], [0], [0], [1], [0, 0, 1, 1], [], []>} : vector<16x16xf32>, vector<16x32xf32>, vector<16x32xf32> -> vector<16x32xf32>
    %c0_5 = arith.constant 0 : index
    %c0_6 = arith.constant 0 : index
    %5 = vector.load %arg4[%c0_5, %c0_6] : memref<32x128xf32, #tpu.memory_space<vmem>>, vector<32x128xf32>
    %cst_7 = arith.constant dense<0.000000e+00> : vector<16x128xf32>
    %6 = tpu.matmul %4, %5, %cst_7 {dimension_numbers = #tpu.dot_dimension_numbers<[1], [0], [0], [1], [0, 0, 1, 1], [], []>} : vector<16x32xf32>, vector<32x128xf32>, vector<16x128xf32> -> vector<16x128xf32>
    %cst_8 = arith.constant 0.000000e+00 : f32
    %7 = vector.broadcast %cst_8 : f32 to vector<16x128xf32>
    %8 = arith.maximumf %6, %7 : vector<16x128xf32>
    %9 = tpu.iota {dimensions = array<i32: 1>} : vector<16x128xi32>
    %cst_9 = arith.constant dense<0.000000e+00> : vector<16xf32>
    %10 = vector.multi_reduction <add>, %8, %cst_9 [1] : vector<16x128xf32> to vector<16xf32>
    %11 = vector.shape_cast %10 : vector<16xf32> to vector<16x1xf32>
    %cst_10 = arith.constant 3.125000e-02 : f32
    %12 = vector.broadcast %cst_10 : f32 to vector<16x1xf32>
    %13 = arith.mulf %11, %12 : vector<16x1xf32>
    %14 = vector.broadcast %13 : vector<16x1xf32> to vector<16x128xf32>
    %15 = arith.subf %8, %14 : vector<16x128xf32>
    %c32_i32 = arith.constant 32 : i32
    %16 = vector.broadcast %c32_i32 : i32 to vector<16x128xi32>
    %17 = arith.cmpi slt, %9, %16 : vector<16x128xi32>
    %cst_11 = arith.constant 0.000000e+00 : f32
    %18 = vector.broadcast %cst_11 : f32 to vector<16x128xf32>
    %19 = arith.select %17, %15, %18 : vector<16x128xi1>, vector<16x128xf32>
    %20 = arith.mulf %19, %19 : vector<16x128xf32>
    %cst_12 = arith.constant dense<0.000000e+00> : vector<16xf32>
    %21 = vector.multi_reduction <add>, %20, %cst_12 [1] : vector<16x128xf32> to vector<16xf32>
    %22 = vector.shape_cast %21 : vector<16xf32> to vector<16x1xf32>
    %cst_13 = arith.constant 3.125000e-02 : f32
    %23 = vector.broadcast %cst_13 : f32 to vector<16x1xf32>
    %24 = arith.mulf %22, %23 : vector<16x1xf32>
    %cst_14 = arith.constant 9.99999974E-6 : f32
    %25 = vector.broadcast %cst_14 : f32 to vector<16x1xf32>
    %26 = arith.addf %24, %25 : vector<16x1xf32>
    %27 = math.rsqrt %26 : vector<16x1xf32>
    %28 = vector.broadcast %27 : vector<16x1xf32> to vector<16x128xf32>
    %29 = arith.mulf %15, %28 : vector<16x128xf32>
    %c0_15 = arith.constant 0 : index
    %c0_16 = arith.constant 0 : index
    %30 = vector.load %arg5[%c0_15, %c0_16] : memref<1x128xf32, #tpu.memory_space<vmem>>, vector<1x128xf32>
    %31 = vector.broadcast %30 : vector<1x128xf32> to vector<16x128xf32>
    %32 = arith.mulf %29, %31 : vector<16x128xf32>
    %c0_17 = arith.constant 0 : index
    %c0_18 = arith.constant 0 : index
    %33 = vector.load %arg6[%c0_17, %c0_18] : memref<1x128xf32, #tpu.memory_space<vmem>>, vector<1x128xf32>
    %34 = vector.broadcast %33 : vector<1x128xf32> to vector<16x128xf32>
    %35 = arith.addf %32, %34 : vector<16x128xf32>
    %c0_19 = arith.constant 0 : index
    %c0_20 = arith.constant 0 : index
    %c0_21 = arith.constant 0 : index
    %36 = vector.load %arg7[%c0_19, %c0_20, %c0_21] : memref<1x16x128xf32, #tpu.memory_space<vmem>>, vector<1x16x128xf32>
    %37 = vector.shape_cast %36 : vector<1x16x128xf32> to vector<16x128xf32>
    %38 = vector.shape_cast %35 : vector<16x128xf32> to vector<1x16x128xf32>
    tpu.vector_store %arg7[%c0_19, %c0_20, %c0_21], %38 {strides = array<i32>} : memref<1x16x128xf32, #tpu.memory_space<vmem>>, vector<1x16x128xf32>,
    return
  }
  func.func @transform_0(%arg0: i32, %arg1: i32) -> (i32, i32, i32) {
    %c0_i32 = arith.constant 0 : i32
    %c0_i32_0 = arith.constant 0 : i32
    return %arg0, %arg1, %c0_i32 : i32, i32, i32
  }
  func.func @transform_1(%arg0: i32, %arg1: i32) -> (i32, i32, i32) {
    %c0_i32 = arith.constant 0 : i32
    %c0_i32_0 = arith.constant 0 : i32
    %c0_i32_1 = arith.constant 0 : i32
    return %arg0, %c0_i32, %c0_i32_0 : i32, i32, i32
  }
  func.func @transform_2(%arg0: i32, %arg1: i32) -> (i32, i32) {
    %c0_i32 = arith.constant 0 : i32
    %c0_i32_0 = arith.constant 0 : i32
    %c0_i32_1 = arith.constant 0 : i32
    return %c0_i32, %c0_i32_0 : i32, i32
  }
  func.func @transform_3(%arg0: i32, %arg1: i32) -> (i32, i32) {
    %c0_i32 = arith.constant 0 : i32
    %c0_i32_0 = arith.constant 0 : i32
    %c0_i32_1 = arith.constant 0 : i32
    return %c0_i32, %c0_i32_0 : i32, i32
  }
  func.func @transform_4(%arg0: i32, %arg1: i32) -> (i32, i32) {
    %c0_i32 = arith.constant 0 : i32
    %c0_i32_0 = arith.constant 0 : i32
    %c0_i32_1 = arith.constant 0 : i32
    return %c0_i32, %c0_i32_0 : i32, i32
  }
  func.func @transform_5(%arg0: i32, %arg1: i32) -> (i32, i32, i32) {
    %c0_i32 = arith.constant 0 : i32
    %c0_i32_0 = arith.constant 0 : i32
    return %arg0, %arg1, %c0_i32 : i32, i32, i32
  }
}

</mosaic_0001>

<bundles_post_ra>
// kernel: tpu_custom_call.1
= control target key start
LH: loop header
LB: loop body
LE: loop exit
PB: predicated region body
PF: predicated region fallthrough
CT: control target
= control target key end

     0   :  { %s1102_s0 = inlined_call_operand.hbm [shape: f32[2,16,16], index: 0, kind: input, shape index: {}]   ;;  %s1103_s1 = inlined_call_operand.hbm [shape: f32[2,16,32], index: 1, kind: input, shape index: {}]   ;;  %s1104_s2 = inlined_call_operand.hbm [shape: f32[32,128], index: 2, kind: input, shape index: {}]   ;;  %s1105_s3 = inlined_call_operand.vmem [shape: f32[1,128], index: 3, kind: input, shape index: {}]   ;;  %s1106_s4 = inlined_call_operand.vmem [shape: f32[1,128], index: 4, kind: input, shape index: {}]   ;;  %s1107_s5 = inlined_call_operand.hbm [shape: f32[2,16,128], index: 5, kind: output, shape index: {}]  }
   0x1   :  { %1115 = sst [smem:[#allocation17_spill]] %s1104_s2 }
   0x2   :  { %10 = vsyncpa [#allocation3], 0 }
   0x3   :  { %12 = vsyncpa [#allocation3 + $0x1], 0 }
   0x4   :  { %13 = vsyncpa [#allocation6], 0 }
   0x5   :  { %15 = vsyncpa [#allocation6 + $0x1], 0 }
   0x6   :  { %16 = vsyncpa [#allocation4], 0 }
   0x7   :  { %18 = vsyncpa [#allocation4 + $0x1], 0  ;;  %s928_s18 = smov 0   ;;  %s930_s19 = smov 0  }
   0x8   :  { %s932_s20 = smov 0   ;;  %s934_s21 = smov 0  }
   0x9   :  { %s936_s22 = smov 0   ;;  %s938_s23 = smov 0  }
   0xa LB: > { %1116 = sst [smem:[#allocation13_spill]] %s887_s22  ;;  %s959_s24 = sadd.s32 4294967295, %s891_s23   ;;  %s891_s23 = sphi %s938_s23, %s24_s23   ;;  %s887_s22 = sphi %s936_s22, %s1131_s22   ;;  %s883_s21 = sphi %s934_s21, %s1130_s21   ;;  %s879_s20 = sphi %s932_s20, %s1134_s20   ;;  %s875_s19 = sphi %s930_s19, %s1133_s19   ;;  %s871_s18 = sphi %s928_s18, %s1132_s18  }
   0xb   : > { %s590_s25 = sadd.s32 4294967294, %s891_s23   ;;  %p58_p0 = scmp.ne.s32.totalorder %s875_s19, %s871_s18 }
   0xc   : > { %p59_p1 = scmp.eq.s32.totalorder %s959_s24, 0  ;;  %p173_p2 = scmp.eq.s32.totalorder %s959_s24, 1 }
   0xd   : > { %p179_p3 = scmp.eq.s32.totalorder %s590_s25, 1  ;;  %p591_p5 = scmp.ge.s32.totalorder %s891_s23, 1 }
   0xe   : > { %p968_p4 = por %p59_p1, %p58_p0  ;;  %p186_p7 = scmp.lt.s32.totalorder %s891_s23, 3 }
   0xf   : > { %p973_p6 = por %p179_p3, %p58_p0  ;;  %s1120_s2 = sld [smem:[#allocation17_spill]] }
  0x10   : > { %p981_p8 = pnand %p591_p5, %p186_p7  ;;  %s893_s7 = smov [#allocation7]  }
  0x11   : > { %s1118_s27 = scalar_select %p973_p6, 1, 0 }
  0x12   : > { %p633_p9 = pneg %p981_p8  ;;  %s199_s8 = sshll.u32 %s893_s7, 4  ;;  %s200_s8 = int_to_ptr.vmem [resolvable:$true] %s199_s8 }
  0x13   : > { %1119 = sst [smem:[#allocation14_spill]] %s1118_s27  ;;  %p593_p11 = scmp.ge.s32.totalorder %s891_s23, 2 }
  0x14   : > { %p634_p10 = pnand %p633_p9, %p59_p1  ;;  %s1108_s9 = smov 128  }
  0x15   : > { %s197_s30 = sshll.u32 %s1120_s2, 4  ;;  %s1110_s10 = smov 8   ;;  %s198_s30 = int_to_ptr.hbm [resolvable:$true] %s197_s30 }
  0x16   : > { %636 = dma.hbm_to_vmem [thread:$0]  (!%p634_p10), %s198_s30, 512, %s200_s8, [#allocation6], %s1108_s9, %s1108_s9, %s1110_s10  }
  0x17   : > { %s36_s11 = sadd.s32 1, %s887_s22  ;;  %s45_s12 = sadd.s32 1, %s879_s20 }
  0x18   : > { %p38_p12 = scmp.ge.s32.totalorder %s36_s11, 2  ;;  %p52_p13 = scmp.ne.s32.totalorder %s879_s20, %s875_s19 }
  0x19   : > { %p53_p0 = scmp.eq.s32.totalorder %s891_s23, 0  ;;  %p649_p7 = scmp.lt.s32.totalorder %s891_s23, 2 }
  0x1a   : > { %s1136_s11 = smov (%p38_p12, %s36_s11), 0  ;;  %p1006_p5 = por %p173_p2, %p52_p13 }
  0x1b   : > { %1122 = sst [smem:[#allocation15_spill]] %s1136_s11  ;;  %p1000_p3 = por %p53_p0, %p52_p13 }
  0x1c   : > { %s40_s15 = ssub.s32 %s887_s22, %s1136_s11  ;;  %s219_s16 = sand.u32 1, %s879_s20  }
  0x1d   : > { %p43_p9 = scmp.eq.s32.totalorder %s40_s15, 0  ;;  %s594_s17 = sshll.u32 %s219_s16, 4 }
  0x1e   : > { %s614_s28 = sshll.u32 %s887_s22, 4  ;;  %s223_s8 = scalar_lea.vmem [#allocation2], %s594_s17 }
  0x1f   : > { %s1015_s25 = scalar_select %p43_p9, %s879_s20, %s45_s12  }
  0x20   : > { %s230_s7 = scalar_lea.hbm %s1102_s0, %s614_s28  ;;  %s233_s9 = sshll.u32 %s223_s8, 4  ;;  %s234_s9 = int_to_ptr.vmem [resolvable:$true] %s233_s9 }
  0x21   : > { %1125 = sst [smem:[#allocation16_spill]] %s1015_s25  ;;  %s231_s10 = sshll.u32 %s230_s7, 4  ;;  %s232_s10 = int_to_ptr.hbm [resolvable:$true] %s231_s10 }
  0x22   : > { %p638_p2 = pnand %p649_p7, %p1000_p3  ;;  %s252_s15 = scalar_lea.hbm %s1103_s1, %s614_s28 }
  0x23   : > { %s253_s27 = sshll.u32 %s252_s15, 4  ;;  %s220_s12 = scalar_lea.sflag [#allocation3], %s219_s16  ;;  %s254_s27 = int_to_ptr.hbm [resolvable:$true] %s253_s27 }
  0x24   : > { %s1126_s25 = smov 8   ;;  %s1127_s22 = smov 128  }
  0x25   : > { %640 = dma.hbm_to_vmem [thread:$0]  (!%p638_p2), %s232_s10, 256, %s234_s9, %s220_s12, %s1127_s22, %s1127_s22, %s1126_s25  }
  0x26   : > { %s247_s29 = scalar_lea.vmem [#allocation5], %s594_s17  ;;  %s243_s8 = sand.u32 1, %s891_s23  }
  0x27   : > { %s255_s30 = sshll.u32 %s247_s29, 4  ;;  %s244_s7 = scalar_lea.sflag [#allocation6], %s243_s8  ;;  %s256_s30 = int_to_ptr.vmem [resolvable:$true] %s255_s30 }
  0x28   : > { %643 = dma.hbm_to_vmem [thread:$0]  (!%p638_p2), %s254_s27, 256, %s256_s30, %s244_s7, %s1127_s22, %s1127_s22, %s1126_s25  }
  0x29   : > { %267 = sbr.rel (%p981_p8) target bundleno = 594 (0x252), region = 40  ;;  %s1036_s2 = sand.u32 (!%p981_p8), 1, %s875_s19  }
  0x2a   : > { %s1039_s9 = sshll.u32 (!%p981_p8), %s1036_s2, 4  ;;  %s270_s10 = scalar_lea.sflag (!%p981_p8), [#allocation3], %s1036_s2 }
  0x2b   : > { %s273_s11 = scalar_lea.vmem (!%p981_p8), [#allocation2], %s1039_s9 }
  0x2e   : > { %854 = dma.done.wait (%p968_p4), %s270_s10, 256  }
  0x2f   : > { %856 = vsyncadd (%p968_p4), %s270_s10, 4294967040  ;;  %s279_s22 = sand.u32 1, %s959_s24   ;;  %s283_s6 = scalar_lea.vmem [#allocation5], %s1039_s9 }
  0x30   : > { %s280_s27 = scalar_lea.sflag [#allocation6], %s279_s22 }
  0x31   : > { %858 = dma.done.wait (%p968_p4), %s280_s27, 256  }
  0x32   : > { %860 = vsyncadd (%p968_p4), %s280_s27, 4294967040 }
  0x33   : > { %862 = dma.done.wait (%p59_p1), [#allocation6], 512  }
  0x34   : > { %864 = vsyncadd (%p59_p1), [#allocation6], 4294966784  ;;  %v326_v0 = vld [vmem:[%s283_s6 + $0x8] sm:$0xff]  ;;  %v325_v1 = vld [vmem:[%s283_s6] sm:$0xff]  ;;  %vm327_vm0 = vcmask 130048   ;;  %vm361_vm1 = vcmask 261120   ;;  %v393_v14 = vlaneseq }
  0x35   : > { %348 = vmatpush.msra.mxu0 %v326_v0  ;;  %617 = vmatpush.msra.mxu3 %v326_v0  ;;  %v323_v2 = vld [vmem:[%s273_s11] sm:$0xff]  ;;  %v324_v3 = vld [vmem:[%s273_s11 + $0x8] sm:$0xff]  ;;  %s320_s17 = scalar_lea.vmem [#allocation8], %s1039_s9  ;;  %s616_s25 = sshll.u32 %s883_s21, 4 }
  0x36   : > { %v360_v4 = vld [vmem:[#allocation7 + $0x18] sm:$0xff]  ;;  %v359_v5 = vld [vmem:[#allocation7 + $0x10] sm:$0xff]  ;;  %v358_v6 = vld [vmem:[#allocation7 + $0x8] sm:$0xff]  ;;  %v394_v15 = vand.u32 127, %v393_v14  ;;  %s466_s12 = scalar_lea.hbm %s1107_s5, %s616_s25  ;;  %s467_s29 = sshll.u32 %s320_s17, 4  ;;  %s468_s29 = int_to_ptr.vmem [resolvable:$true] %s467_s29 }
  0x37   : > { %380 = vmatpush.msra.mxu1 %v360_v4  ;;  %619 = vmatpush.msra.mxu2 %v360_v4  ;;  %v357_v7 = vld [vmem:[#allocation7] sm:$0xff]  ;;  %s469_s30 = sshll.u32 %s466_s12, 4  ;;  %s453_s21 = scalar_lea.sflag [#allocation4], %s1036_s2  ;;  %s470_s30 = int_to_ptr.hbm [resolvable:$true] %s469_s30 }
  0x38   : > { %349 = vmatpush.msra.mxu0 %v325_v1  ;;  %618 = vmatpush.msra.mxu3 %v325_v1  ;;  %vm403_vm2 = vcmp.lt.s32.totalorder %v394_v15, 32  ;;  %v705_v38 = vld [vmem:[%s1105_s3] ss:$0 sm:$0xff]  ;;  %s815_s8 = sshra.s32 %s470_s30, 4  ;;  %s821_s11 = scalar_lea.hbm %s1107_s5, 32  ;;  %s816_s8 = int_to_ptr.hbm [resolvable:$true] %s815_s8 }
  0x39   : > { %605 = vmatmul.msk.f32.vlgmr.msra.gmra.mxu0 %vm327_vm0, %v323_v2  ;;  %606 = vmatmul.msk.f32.vlgmr.msra.gmra.mxu3 %vm327_vm0, %v324_v3  ;;  %v706_v41 = vld [vmem:[%s1106_s4] ss:$0 sm:$0xff]  ;;  %s817_s7 = scalar_lea.hbm %s816_s8, 16  ;;  %p822_p10 = scmp.lt.s32.totalorder %s816_s8, %s1107_s5 }
  0x3a   : > { %381 = vmatpush.msra.mxu1 %v359_v5  ;;  %620 = vmatpush.msra.mxu2 %v359_v5  ;;  %p818_p1 = scmp.ne.s32.totalorder %s816_s8, %s817_s7  ;;  %p823_p12 = scmp.lt.s32.totalorder %s821_s11, %s817_s7 }
  0x3c   : > { %382 = vmatpush.msra.mxu1 %v358_v6  ;;  %621 = vmatpush.msra.mxu2 %v358_v6  ;;  %p819_p4 = pnand %p818_p1, %p1006_p5  ;;  %p824_p13 = por %p823_p12, %p822_p10 }
  0x3e   : > { %383 = vmatpush.msra.mxu1 %v357_v7  ;;  %622 = vmatpush.msra.mxu2 %v357_v7  ;;  %p820_p8 = pneg %p819_p4 }
  0x40   : > { %p825_p0 = pnand %p824_p13, %p820_p8 }
  0xb6   : > { %v351_v8 = vpop.f32.mrf.mxu0 }
  0xb7   : > { %607 = vmatmul.msk.f32.vlgmr.msra.gmra.mxu1 %vm361_vm1, %v351_v8 }
  0xbc   : > { %v354_v9 = vpop.f32.mrf.mxu3 }
  0xbd   : > { %608 = vmatmul.msk.f32.vlgmr.msra.gmra.mxu2 %vm361_vm1, %v354_v9 }
 0x134   : > { %v385_v10 = vpop.f32.mrf.mxu1 }
 0x135   : > { %v391_v11 = vmax.f32 %v385_v10, 0.0 }
 0x137   : > { %395 = vadd.xlane.f32.xlu0 %v391_v11 }
 0x140   : > { %v388_v12 = vpop.f32.mrf.mxu2 }
 0x141   : > { %v392_v13 = vmax.f32 %v388_v12, 0.0 }
 0x143   : > { %397 = vadd.xlane.f32.xlu0 %v392_v13 }
 0x1aa   : > { %v396_v16 = vpop.xlane.xlu0 %395 }
 0x1ab   : > { %v399_v17 = vmul.f32 0.03125, %v396_v16 }
 0x1ad   : > { %v401_v18 = vsub.f32 %v391_v11, %v399_v17 }
 0x1af   : > { %v404_v19 = vsel %vm403_vm2, %v401_v18, 0.0 }
 0x1b0   : > { %v406_v20 = vmul.f32 %v404_v19, %v404_v19 }
 0x1b2   : > { %408 = vadd.xlane.f32.xlu1 %v406_v20 }
 0x1b6   : > { %v398_v21 = vpop.xlane.xlu0 %397 }
 0x1b7   : > { %v400_v22 = vmul.f32 0.03125, %v398_v21 }
 0x1b9   : > { %v402_v23 = vsub.f32 %v392_v13, %v400_v22 }
 0x1bb   : > { %v405_v24 = vsel %vm403_vm2, %v402_v23, 0.0 }
 0x1bc   : > { %v407_v25 = vmul.f32 %v405_v24, %v405_v24 }
 0x1be   : > { %410 = vadd.xlane.f32.xlu1 %v407_v25 }
 0x225   : > { %v409_v26 = vpop.xlane.xlu1 %408 }
 0x226   : > { %v412_v27 = vmul.f32 0.03125, %v409_v26 }
 0x228   : > { %v414_v28 = vadd.f32 1e-05, %v412_v27 }
 0x22a   : > { %707 = vrsqrt.f32 %v414_v28  ;;  %vm422_vm4 = vweird.f32 %v414_v28 }
 0x230   : > { %v708_v29 = vpop.eup %707 }
 0x231   : > { %v417_v30 = vmul.f32 %v708_v29, %v414_v28  ;;  %v411_v31 = vpop.xlane.xlu1 %410  ;;  %vm423_vm3 = vweird.f32 %v708_v29 }
 0x232   : > { %v413_v32 = vmul.f32 0.03125, %v411_v31  ;;  %vm424_vm5 = vmor %vm422_vm4, %vm423_vm3 }
 0x233   : > { %v418_v33 = vmul.f32 %v708_v29, %v417_v30 }
 0x234   : > { %v415_v34 = vadd.f32 1e-05, %v413_v32 }
 0x235   : > { %v419_v35 = vmul.f32 0.5, %v418_v33 }
 0x236   : > { %709 = vrsqrt.f32 %v415_v34  ;;  %vm432_vm7 = vweird.f32 %v415_v34 }
 0x237   : > { %v420_v36 = vsub.f32 1.5, %v419_v35 }
 0x239   : > { %v421_v37 = vmul.f32 %v708_v29, %v420_v36 }
 0x23b   : > { %v425_v39 = vsel %vm424_vm5, %v708_v29, %v421_v37 }
 0x23c   : > { %v710_v40 = vpop.eup %709  ;;  %v436_v42 = vmul.f32 %v425_v39, %v401_v18 }
 0x23d   : > { %v427_v43 = vmul.f32 %v710_v40, %v415_v34  ;;  %vm433_vm6 = vweird.f32 %v710_v40 }
 0x23e   : > { %v442_v44 = vmul.f32 %v705_v38, %v436_v42  ;;  %vm434_vm8 = vmor %vm432_vm7, %vm433_vm6 }
 0x23f   : > { %v428_v45 = vmul.f32 %v710_v40, %v427_v43 }
 0x240   : > { %v448_v46 = vadd.f32 %v706_v41, %v442_v44 }
 0x241   : > { %v429_v47 = vmul.f32 0.5, %v428_v45 }
 0x242   : > { %450 = vst [vmem:[%s320_s17] sm:$0xff] %v448_v46 }
 0x243   : > { %v430_v48 = vsub.f32 1.5, %v429_v47 }
 0x245   : > { %v431_v49 = vmul.f32 %v710_v40, %v430_v48 }
 0x247   : > { %v435_v50 = vsel %vm434_vm8, %v710_v40, %v431_v49 }
 0x248   : > { %v437_v51 = vmul.f32 %v435_v50, %v402_v23 }
 0x24a   : > { %v443_v52 = vmul.f32 %v705_v38, %v437_v51 }
 0x24c   : > { %v449_v53 = vadd.f32 %v706_v41, %v443_v52 }
 0x24e   : > { %451 = vst [vmem:[%s320_s17 + $0x8] sm:$0xff] %v449_v53 }
 0x24f   : > { %828 = shalt.err (!%p825_p0)
}
 0x250   : > { %s896_s2 = smov 128   ;;  %s897_s6 = smov 8  }
 0x251   : > { %631 = dma.vmem_to_hbm [thread:$0]  (%p1006_p5), %s468_s29, 256, %s470_s30, %s453_s21, %s896_s2, %s896_s2, %s897_s6  }
 0x252 PF: > { %s484_s26 = sand.u32 1, %s871_s18   ;;  %p645_p3 = pnand %p593_p11, %p973_p6 }
 0x253   : > { %s485_s13 = scalar_lea.sflag [#allocation4], %s484_s26 }
 0x254   : > { %p646_p7 = pneg %p645_p3 }
 0x256   : > { %866 = dma.done.wait (%p646_p7), %s485_s13, 256  }
 0x257   : > { %868 = vsyncadd (%p646_p7), %s485_s13, 4294967040  ;;  %s24_s23 = sadd.s32 1, %s891_s23   ;;  %s1129_s16 = sld [smem:[#allocation16_spill]] }
 0x258   : > { %p21_p9 = scmp.ge.s32.totalorder %s24_s23, 4   ;;  %s1130_s21 = sld [smem:[#allocation13_spill]] }
 0x259   : > { %s1131_s22 = sld [smem:[#allocation15_spill]]  ;;  %s1132_s18 = smov %s875_s19 }
 0x25a   : > { %s1133_s19 = smov %s879_s20  ;;  %23 = sbr.rel (!%p21_p9) target bundleno = 10 (0xa), region = 102 }
 0x25d   : > { %s1134_s20 = smov %s1129_s16 }
 0x25f   :  { %491 = vsyncpa [#allocation3], 1 }
 0x260   :  { %493 = vsyncpa [#allocation3 + $0x1], 1 }
 0x261   :  { %494 = vsyncpa [#allocation6], 1 }
 0x262   :  { %496 = vsyncpa [#allocation6 + $0x1], 1 }
 0x263   :  { %497 = vsyncpa [#allocation4], 1 }
 0x264   :  { %499 = vsyncpa [#allocation4 + $0x1], 1 }

</bundles_post_ra>
